<compile_context>
chip_gen: v5e
topology: v5e:2x2
jax: 0.10.0
libtpu: 0.0.40
codegen_flags: <defaults>
</compile_context>

<pallas_src>
import functools

import jax
import jax.numpy as jnp
from jax import lax
from jax.experimental import pallas as pl
from jax.experimental.pallas import tpu as pltpu


def _round_up(x, m):
    return ((x + m - 1) // m) * m


def _temporal_block_kernel(kernel_size, dilation, pad, has_downsample, *refs):
    """Fused TemporalBlock forward for one (batch, L-tile) grid step.

    refs (has_downsample=True):
      x_ref  : (LT, Cin_p)   bf16 input tile, channels last, channel-padded
      w1_ref : (K*Cin_p, Cout_p)  bf16 conv1 weight (taps stacked along rows)
      b1_ref : (1, Cout_p)   f32
      w2_ref : (K*Cout_p, Cout_p) bf16 conv2 weight
      b2_ref : (1, Cout_p)   f32
      wd_ref : (Cin_p, Cout_p) bf16 downsample weight   [only if has_downsample]
      bd_ref : (1, Cout_p)     f32 downsample bias      [only if has_downsample]
      y_ref  : (LT, Cout_p)  f32 output tile
      xh_ref : (LT+pad, Cin_p)  bf16 scratch: x tile behind its causal carry
      h1h_ref: (LT+pad, Cout_p) bf16 scratch: h1 tile behind its causal carry
    """
    if has_downsample:
        (x_ref, w1_ref, b1_ref, w2_ref, b2_ref, wd_ref, bd_ref,
         y_ref, xh_ref, h1h_ref) = refs
    else:
        (x_ref, w1_ref, b1_ref, w2_ref, b2_ref,
         y_ref, xh_ref, h1h_ref) = refs
        wd_ref = bd_ref = None

    lt = y_ref.shape[0]
    c_out_p = y_ref.shape[1]
    c_in_p = x_ref.shape[1]
    i = pl.program_id(1)  # L-tile index (sequential / "arbitrary" axis)

    # Reset the causal carry at the start of every batch element. (Cannot be a
    # one-time init: the batch axis is "parallel", so every (b, 0) step resets.)
    if pad > 0:
        @pl.when(i == 0)
        def _():
            xh_ref[0:pad, :] = jnp.zeros((pad, c_in_p), xh_ref.dtype)
            h1h_ref[0:pad, :] = jnp.zeros((pad, c_out_p), h1h_ref.dtype)

    # Stage the current x tile behind its pad-row causal carry.
    xh_ref[pad:pad + lt, :] = x_ref[...]

    # ---- conv1 (causal, dilated): K taps fused into one MXU matmul ----
    if kernel_size > 1:
        xa = jnp.concatenate(
            [xh_ref[pl.ds(j * dilation, lt), :] for j in range(kernel_size)],
            axis=-1)                                     # (LT, K*Cin_p)
    else:
        xa = xh_ref[pl.ds(0, lt), :]
    acc1 = jnp.dot(xa, w1_ref[...], preferred_element_type=jnp.float32)
    h1 = jnp.maximum(acc1 + b1_ref[...], 0.0)            # (LT, Cout_p) f32
    # dropout1: identity (eval mode)

    # Stage h1 (bf16, so conv2 feeds the MXU natively) behind its causal carry.
    h1h_ref[pad:pad + lt, :] = h1.astype(h1h_ref.dtype)

    # ---- conv2 (causal, dilated): fused taps ----
    if kernel_size > 1:
        ha = jnp.concatenate(
            [h1h_ref[pl.ds(j * dilation, lt), :] for j in range(kernel_size)],
            axis=-1)                                     # (LT, K*Cout_p)
    else:
        ha = h1h_ref[pl.ds(0, lt), :]
    acc2 = jnp.dot(ha, w2_ref[...], preferred_element_type=jnp.float32)
    out = jnp.maximum(acc2 + b2_ref[...], 0.0)
    # dropout2: identity (eval mode)

    # ---- residual path + final ReLU ----
    if has_downsample:
        res = jnp.dot(x_ref[...], wd_ref[...],
                      preferred_element_type=jnp.float32) + bd_ref[...]
    else:
        res = x_ref[...].astype(jnp.float32)
    y_ref[...] = jnp.maximum(out + res, 0.0).astype(y_ref.dtype)

    # ---- carry the last `pad` rows of x and h1 into the next L tile ----
    if pad > 0:
        xh_ref[0:pad, :] = x_ref[pl.ds(lt - pad, pad), :]
        h1h_ref[0:pad, :] = h1[lt - pad:, :].astype(h1h_ref.dtype)


def _weight_norm(v, g):
    """PyTorch weight_norm forward: w = g * v / ||v|| (norm over dims (1,2))."""
    n = jnp.sqrt(jnp.sum(v * v, axis=(1, 2), keepdims=True))
    return g * v / n


def temporal_block_forward(x, params, *, kernel_size, stride, dilation, padding,
                           dropout=0.2, l_tile=512):
    """x: (B, n_inputs, L) float32 (PyTorch Conv1d layout). Returns (B, n_outputs, L)."""
    assert stride == 1, "TODO(synk): stride != 1 not supported"
    assert padding == dilation * (kernel_size - 1), (
        "TemporalBlock's residual add requires padding == dilation*(kernel_size-1)")
    del dropout  # identity in eval mode

    B, c_in, L = x.shape
    pad = padding

    # --- one-time host-side prep (hoisted out of the kernel) ---
    w1 = _weight_norm(params["conv1_v"], params["conv1_g"])   # (Cout, Cin, K)
    w2 = _weight_norm(params["conv2_v"], params["conv2_g"])   # (Cout, Cout, K)
    c_out = w1.shape[0]
    has_downsample = "down_w" in params
    if not has_downsample:
        assert c_in == c_out, "identity residual requires n_inputs == n_outputs"

    # Lane-dense channel padding.
    c_in_p = _round_up(c_in, 128)
    c_out_p = _round_up(c_out, 128)

    # L tile: multiple of 8, at least `pad` (non-overlapping carry copy), at most
    # the (rounded-up) sequence length.
    lt = min(_round_up(max(l_tile, 8), 8), _round_up(max(L, 8), 8))
    lt = max(lt, _round_up(max(pad, 1), 8))
    L_full = _round_up(L, lt)
    n_tiles = L_full // lt

    def prep_conv_w(w, cin, cin_p):
        # (Cout, Cin, K) -> (K, Cin, Cout) -> channel-pad -> (K*Cin_p, Cout_p) bf16
        wt = jnp.transpose(w, (2, 1, 0))
        wt = jnp.pad(wt, ((0, 0), (0, cin_p - cin), (0, c_out_p - c_out)))
        return wt.reshape(kernel_size * cin_p, c_out_p).astype(jnp.bfloat16)

    w1_f = prep_conv_w(w1, c_in, c_in_p)
    w2_f = prep_conv_w(w2, c_out, c_out_p)
    b1 = jnp.pad(params["conv1_b"], (0, c_out_p - c_out)
                 ).reshape(1, c_out_p).astype(jnp.float32)
    b2 = jnp.pad(params["conv2_b"], (0, c_out_p - c_out)
                 ).reshape(1, c_out_p).astype(jnp.float32)

    x_cl = jnp.transpose(x, (0, 2, 1))                          # (B, L, Cin)
    x_p = jnp.pad(x_cl, ((0, 0), (0, L_full - L), (0, c_in_p - c_in)))
    x_p = x_p.astype(jnp.bfloat16)                              # (B, L_full, Cin_p)

    args = [x_p, w1_f, b1, w2_f, b2]
    in_specs = [
        pl.BlockSpec((None, lt, c_in_p), lambda b, i: (b, i, 0)),        # streamed x
        pl.BlockSpec((kernel_size * c_in_p, c_out_p), lambda b, i: (0, 0)),
        pl.BlockSpec((1, c_out_p), lambda b, i: (0, 0)),
        pl.BlockSpec((kernel_size * c_out_p, c_out_p), lambda b, i: (0, 0)),
        pl.BlockSpec((1, c_out_p), lambda b, i: (0, 0)),
    ]
    if has_downsample:
        wd = jnp.transpose(params["down_w"][:, :, 0], (1, 0))            # (Cin, Cout)
        wd = jnp.pad(wd, ((0, c_in_p - c_in), (0, c_out_p - c_out))
                     ).astype(jnp.bfloat16)
        bd = jnp.pad(params["down_b"], (0, c_out_p - c_out)
                     ).reshape(1, c_out_p).astype(jnp.float32)
        args += [wd, bd]
        in_specs += [
            pl.BlockSpec((c_in_p, c_out_p), lambda b, i: (0, 0)),
            pl.BlockSpec((1, c_out_p), lambda b, i: (0, 0)),
        ]

    kernel = functools.partial(_temporal_block_kernel,
                               kernel_size, dilation, pad, has_downsample)

    y = pl.pallas_call(
        kernel,
        grid=(B, n_tiles),
        in_specs=in_specs,
        out_specs=pl.BlockSpec((None, lt, c_out_p), lambda b, i: (b, i, 0)),
        out_shape=jax.ShapeDtypeStruct((B, L_full, c_out_p), jnp.float32),
        scratch_shapes=[
            pltpu.VMEM((lt + pad, c_in_p), jnp.bfloat16),    # x + causal carry
            pltpu.VMEM((lt + pad, c_out_p), jnp.bfloat16),   # h1 + causal carry
        ],
        compiler_params=pltpu.CompilerParams(
            # batch axis is parallel (megacore); L axis is sequential (carry).
            dimension_semantics=("parallel", "arbitrary"),
            # Footprint is a few MiB thanks to L-tiling; 48 MiB keeps headroom
            # under v7x's 64 MiB while not capping v5e/v6e.
            vmem_limit_bytes=48 * 1024 * 1024,
        ),
    )(*args)
    y = y[:, :L, :c_out]                                        # drop padding
    return jnp.transpose(y, (0, 2, 1))                          # (B, Cout, L)


def make_params(key, n_inputs, n_outputs, kernel_size, with_downsample):
    """Deterministic synthetic parameters matching the nn.Module shapes."""
    ks = jax.random.split(key, 8)
    p = dict(
        conv1_v=jax.random.normal(ks[0], (n_outputs, n_inputs, kernel_size),
                                  jnp.float32) * 0.01,
        conv1_g=jax.random.uniform(ks[1], (n_outputs, 1, 1), jnp.float32, 0.5, 1.5),
        conv1_b=jax.random.normal(ks[2], (n_outputs,), jnp.float32) * 0.1,
        conv2_v=jax.random.normal(ks[3], (n_outputs, n_outputs, kernel_size),
                                  jnp.float32) * 0.01,
        conv2_g=jax.random.uniform(ks[4], (n_outputs, 1, 1), jnp.float32, 0.5, 1.5),
        conv2_b=jax.random.normal(ks[5], (n_outputs,), jnp.float32) * 0.1,
    )
    if with_downsample:
        p["down_w"] = jax.random.normal(ks[6], (n_outputs, n_inputs, 1),
                                        jnp.float32) * 0.01
        p["down_b"] = jax.random.normal(ks[7], (n_outputs,), jnp.float32) * 0.1
    return p


def _reference_forward(x, params, *, kernel_size, stride, dilation, padding):
    """Pure-JAX f32 reference mirroring the PyTorch TemporalBlock (eval mode)."""
    w1 = _weight_norm(params["conv1_v"], params["conv1_g"])
    w2 = _weight_norm(params["conv2_v"], params["conv2_g"])
    dn = ("NCH", "OIH", "NCH")

    def conv(inp, w, b, p, d):
        o = lax.conv_general_dilated(inp, w, window_strides=(stride,),
                                     padding=[(p, p)], rhs_dilation=(d,),
                                     dimension_numbers=dn)
        return o + b[None, :, None]

    out = conv(x, w1, params["conv1_b"], padding, dilation)
    out = out[:, :, :-padding] if padding > 0 else out        # Chomp1d
    out = jnp.maximum(out, 0.0)                                # relu1 (dropout1 = id)
    out = conv(out, w2, params["conv2_b"], padding, dilation)
    out = out[:, :, :-padding] if padding > 0 else out         # Chomp1d
    out = jnp.maximum(out, 0.0)                                # relu2 (dropout2 = id)
    if "down_w" in params:
        res = lax.conv_general_dilated(x, params["down_w"], (1,), [(0, 0)],
                                       dimension_numbers=dn)
        res = res + params["down_b"][None, :, None]
    else:
        res = x
    return jnp.maximum(out + res, 0.0)


if __name__ == "__main__":
    K, D = 3, 2
    PAD = D * (K - 1)  # causal padding, as used in standard TCNs

    key = jax.random.PRNGKey(0)
    k1, k2, k3, kx1, kx2, kx3 = jax.random.split(key, 6)

    # Config 1: n_inputs != n_outputs -> 1x1-conv downsample residual.
    x1 = jax.random.normal(kx1, (2, 4, 16), jnp.float32)
    p1 = make_params(k1, 4, 32, K, with_downsample=True)
    y1 = temporal_block_forward(x1, p1, kernel_size=K, stride=1,
                                dilation=D, padding=PAD)

    # Config 2: n_inputs == n_outputs -> identity residual.
    x2 = jax.random.normal(kx2, (2, 32, 16), jnp.float32)
    p2 = make_params(k2, 32, 32, K, with_downsample=False)
    y2 = temporal_block_forward(x2, p2, kernel_size=K, stride=1,
                                dilation=D, padding=PAD)

    # Config 3: forces L tiling (l_tile=16 over L=40 -> 3 tiles incl. ragged tail)
    # to exercise the cross-tile causal carry.
    x3 = jax.random.normal(kx3, (2, 8, 40), jnp.float32)
    p3 = make_params(k3, 8, 32, K, with_downsample=True)
    y3 = temporal_block_forward(x3, p3, kernel_size=K, stride=1,
                                dilation=D, padding=PAD, l_tile=16)

    jax.block_until_ready((y1, y2, y3))

    y1_ref = _reference_forward(x1, p1, kernel_size=K, stride=1,
                                dilation=D, padding=PAD)
    y2_ref = _reference_forward(x2, p2, kernel_size=K, stride=1,
                                dilation=D, padding=PAD)
    y3_ref = _reference_forward(x3, p3, kernel_size=K, stride=1,
                                dilation=D, padding=PAD)

    assert y1.shape == (2, 32, 16) and y2.shape == (2, 32, 16) and y3.shape == (2, 32, 40)
    # bf16 matmul inputs / f32 accumulation -> loosened tolerances vs f32 reference.
    assert jnp.allclose(y1, y1_ref, atol=5e-2, rtol=5e-2), "mismatch (downsample path)"
    assert jnp.allclose(y2, y2_ref, atol=5e-2, rtol=5e-2), "mismatch (identity residual)"
    assert jnp.allclose(y3, y3_ref, atol=5e-2, rtol=5e-2), "mismatch (L-tiled path)"

    print("KERNEL_OK")
</pallas_src>

<mosaic_0001>
module attributes {stable_mosaic.version = 11 : i64} {
  func.func @_temporal_block_kernel(%arg0: i32, %arg1: i32, %arg2: memref<1x16x128xbf16, #tpu.memory_space<vmem>>, %arg3: memref<384x128xbf16, #tpu.memory_space<vmem>>, %arg4: memref<1x128xf32, #tpu.memory_space<vmem>>, %arg5: memref<384x128xbf16, #tpu.memory_space<vmem>>, %arg6: memref<1x128xf32, #tpu.memory_space<vmem>>, %arg7: memref<128x128xbf16, #tpu.memory_space<vmem>>, %arg8: memref<1x128xf32, #tpu.memory_space<vmem>>, %arg9: memref<1x16x128xf32, #tpu.memory_space<vmem>>, %arg10: memref<20x128xbf16, #tpu.memory_space<vmem>>, %arg11: memref<20x128xbf16, #tpu.memory_space<vmem>>) attributes {dimension_semantics = [#tpu.dimension_semantics<parallel>, #tpu.dimension_semantics<arbitrary>], iteration_bounds = array<i64: 2, 1>, scalar_prefetch = 0 : i64, scratch_operands = 2 : i64, tpu.core_type = #tpu.core_type<tc>, window_params = [{transform_indices = @transform_0, window_bounds = array<i64: 1, 16, 128>}, {pipeline_mode = #tpu.pipeline_mode<synchronous>, transform_indices = @transform_1, window_bounds = array<i64: 384, 128>}, {pipeline_mode = #tpu.pipeline_mode<synchronous>, transform_indices = @transform_2, window_bounds = array<i64: 1, 128>}, {pipeline_mode = #tpu.pipeline_mode<synchronous>, transform_indices = @transform_3, window_bounds = array<i64: 384, 128>}, {pipeline_mode = #tpu.pipeline_mode<synchronous>, transform_indices = @transform_4, window_bounds = array<i64: 1, 128>}, {pipeline_mode = #tpu.pipeline_mode<synchronous>, transform_indices = @transform_5, window_bounds = array<i64: 128, 128>}, {pipeline_mode = #tpu.pipeline_mode<synchronous>, transform_indices = @transform_6, window_bounds = array<i64: 1, 128>}, {transform_indices = @transform_7, window_bounds = array<i64: 1, 16, 128>}]} {
    %c0_i32 = arith.constant 0 : i32
    %0 = arith.cmpi eq, %arg1, %c0_i32 : i32
    %1 = arith.extui %0 : i1 to i32
    %c0_i32_0 = arith.constant 0 : i32
    %2 = arith.cmpi ne, %1, %c0_i32_0 : i32
    scf.if %2 {
      %cst_46 = arith.constant 0.000000e+00 : bf16
      %49 = vector.broadcast %cst_46 : bf16 to vector<4x128xbf16>
      %c0_47 = arith.constant 0 : index
      %c0_48 = arith.constant 0 : index
      %50 = vector.load %arg10[%c0_47, %c0_48] : memref<20x128xbf16, #tpu.memory_space<vmem>>, vector<4x128xbf16>
      tpu.vector_store %arg10[%c0_47, %c0_48], %49 {strides = array<i32>} : memref<20x128xbf16, #tpu.memory_space<vmem>>, vector<4x128xbf16>,
      %cst_49 = arith.constant 0.000000e+00 : bf16
      %51 = vector.broadcast %cst_49 : bf16 to vector<4x128xbf16>
      %c0_50 = arith.constant 0 : index
      %c0_51 = arith.constant 0 : index
      %52 = vector.load %arg11[%c0_50, %c0_51] : memref<20x128xbf16, #tpu.memory_space<vmem>>, vector<4x128xbf16>
      tpu.vector_store %arg11[%c0_50, %c0_51], %51 {strides = array<i32>} : memref<20x128xbf16, #tpu.memory_space<vmem>>, vector<4x128xbf16>,
    } else {
    }
    %c0 = arith.constant 0 : index
    %c0_1 = arith.constant 0 : index
    %c0_2 = arith.constant 0 : index
    %3 = vector.load %arg2[%c0, %c0_1, %c0_2] : memref<1x16x128xbf16, #tpu.memory_space<vmem>>, vector<1x16x128xbf16>
    %4 = vector.shape_cast %3 : vector<1x16x128xbf16> to vector<16x128xbf16>
    %c4 = arith.constant 4 : index
    %c0_3 = arith.constant 0 : index
    %5 = vector.load %arg10[%c4, %c0_3] : memref<20x128xbf16, #tpu.memory_space<vmem>>, vector<16x128xbf16>
    tpu.vector_store %arg10[%c4, %c0_3], %4 {strides = array<i32>} : memref<20x128xbf16, #tpu.memory_space<vmem>>, vector<16x128xbf16>,
    %c0_4 = arith.constant 0 : index
    %c0_5 = arith.constant 0 : index
    %6 = vector.load %arg10[%c0_4, %c0_5] : memref<20x128xbf16, #tpu.memory_space<vmem>>, vector<16x128xbf16>
    %c2 = arith.constant 2 : index
    %c0_6 = arith.constant 0 : index
    %7 = vector.load %arg10[%c2, %c0_6] : memref<20x128xbf16, #tpu.memory_space<vmem>>, vector<16x128xbf16>
    %c4_7 = arith.constant 4 : index
    %c0_8 = arith.constant 0 : index
    %8 = vector.load %arg10[%c4_7, %c0_8] : memref<20x128xbf16, #tpu.memory_space<vmem>>, vector<16x128xbf16>
    %9 = tpu.concatenate %6, %7, %8 in 1 : vector<16x128xbf16>, vector<16x128xbf16>, vector<16x128xbf16> -> vector<16x384xbf16>
    %c0_9 = arith.constant 0 : index
    %c0_10 = arith.constant 0 : index
    %10 = vector.load %arg3[%c0_9, %c0_10] : memref<384x128xbf16, #tpu.memory_space<vmem>>, vector<384x128xbf16>
    %cst = arith.constant dense<0.000000e+00> : vector<16x128xf32>
    %11 = tpu.matmul %9, %10, %cst {dimension_numbers = #tpu.dot_dimension_numbers<[1], [0], [0], [1], [0, 0, 1, 1], [], []>} : vector<16x384xbf16>, vector<384x128xbf16>, vector<16x128xf32> -> vector<16x128xf32>
    %c0_11 = arith.constant 0 : index
    %c0_12 = arith.constant 0 : index
    %12 = vector.load %arg4[%c0_11, %c0_12] : memref<1x128xf32, #tpu.memory_space<vmem>>, vector<1x128xf32>
    %13 = vector.broadcast %12 : vector<1x128xf32> to vector<16x128xf32>
    %14 = arith.addf %11, %13 : vector<16x128xf32>
    %cst_13 = arith.constant 0.000000e+00 : f32
    %15 = vector.broadcast %cst_13 : f32 to vector<16x128xf32>
    %16 = arith.maximumf %14, %15 : vector<16x128xf32>
    %17 = arith.truncf %16 : vector<16x128xf32> to vector<16x128xbf16>
    %c4_14 = arith.constant 4 : index
    %c0_15 = arith.constant 0 : index
    %18 = vector.load %arg11[%c4_14, %c0_15] : memref<20x128xbf16, #tpu.memory_space<vmem>>, vector<16x128xbf16>
    tpu.vector_store %arg11[%c4_14, %c0_15], %17 {strides = array<i32>} : memref<20x128xbf16, #tpu.memory_space<vmem>>, vector<16x128xbf16>,
    %c0_16 = arith.constant 0 : index
    %c0_17 = arith.constant 0 : index
    %19 = vector.load %arg11[%c0_16, %c0_17] : memref<20x128xbf16, #tpu.memory_space<vmem>>, vector<16x128xbf16>
    %c2_18 = arith.constant 2 : index
    %c0_19 = arith.constant 0 : index
    %20 = vector.load %arg11[%c2_18, %c0_19] : memref<20x128xbf16, #tpu.memory_space<vmem>>, vector<16x128xbf16>
    %c4_20 = arith.constant 4 : index
    %c0_21 = arith.constant 0 : index
    %21 = vector.load %arg11[%c4_20, %c0_21] : memref<20x128xbf16, #tpu.memory_space<vmem>>, vector<16x128xbf16>
    %22 = tpu.concatenate %19, %20, %21 in 1 : vector<16x128xbf16>, vector<16x128xbf16>, vector<16x128xbf16> -> vector<16x384xbf16>
    %c0_22 = arith.constant 0 : index
    %c0_23 = arith.constant 0 : index
    %23 = vector.load %arg5[%c0_22, %c0_23] : memref<384x128xbf16, #tpu.memory_space<vmem>>, vector<384x128xbf16>
    %cst_24 = arith.constant dense<0.000000e+00> : vector<16x128xf32>
    %24 = tpu.matmul %22, %23, %cst_24 {dimension_numbers = #tpu.dot_dimension_numbers<[1], [0], [0], [1], [0, 0, 1, 1], [], []>} : vector<16x384xbf16>, vector<384x128xbf16>, vector<16x128xf32> -> vector<16x128xf32>
    %c0_25 = arith.constant 0 : index
    %c0_26 = arith.constant 0 : index
    %25 = vector.load %arg6[%c0_25, %c0_26] : memref<1x128xf32, #tpu.memory_space<vmem>>, vector<1x128xf32>
    %26 = vector.broadcast %25 : vector<1x128xf32> to vector<16x128xf32>
    %27 = arith.addf %24, %26 : vector<16x128xf32>
    %cst_27 = arith.constant 0.000000e+00 : f32
    %28 = vector.broadcast %cst_27 : f32 to vector<16x128xf32>
    %29 = arith.maximumf %27, %28 : vector<16x128xf32>
    %c0_28 = arith.constant 0 : index
    %c0_29 = arith.constant 0 : index
    %c0_30 = arith.constant 0 : index
    %30 = vector.load %arg2[%c0_28, %c0_29, %c0_30] : memref<1x16x128xbf16, #tpu.memory_space<vmem>>, vector<1x16x128xbf16>
    %31 = vector.shape_cast %30 : vector<1x16x128xbf16> to vector<16x128xbf16>
    %c0_31 = arith.constant 0 : index
    %c0_32 = arith.constant 0 : index
    %32 = vector.load %arg7[%c0_31, %c0_32] : memref<128x128xbf16, #tpu.memory_space<vmem>>, vector<128x128xbf16>
    %cst_33 = arith.constant dense<0.000000e+00> : vector<16x128xf32>
    %33 = tpu.matmul %31, %32, %cst_33 {dimension_numbers = #tpu.dot_dimension_numbers<[1], [0], [0], [1], [0, 0, 1, 1], [], []>} : vector<16x128xbf16>, vector<128x128xbf16>, vector<16x128xf32> -> vector<16x128xf32>
    %c0_34 = arith.constant 0 : index
    %c0_35 = arith.constant 0 : index
    %34 = vector.load %arg8[%c0_34, %c0_35] : memref<1x128xf32, #tpu.memory_space<vmem>>, vector<1x128xf32>
    %35 = vector.broadcast %34 : vector<1x128xf32> to vector<16x128xf32>
    %36 = arith.addf %33, %35 : vector<16x128xf32>
    %37 = arith.addf %29, %36 : vector<16x128xf32>
    %cst_36 = arith.constant 0.000000e+00 : f32
    %38 = vector.broadcast %cst_36 : f32 to vector<16x128xf32>
    %39 = arith.maximumf %37, %38 : vector<16x128xf32>
    %c0_37 = arith.constant 0 : index
    %c0_38 = arith.constant 0 : index
    %c0_39 = arith.constant 0 : index
    %40 = vector.load %arg9[%c0_37, %c0_38, %c0_39] : memref<1x16x128xf32, #tpu.memory_space<vmem>>, vector<1x16x128xf32>
    %41 = vector.shape_cast %40 : vector<1x16x128xf32> to vector<16x128xf32>
    %42 = vector.shape_cast %39 : vector<16x128xf32> to vector<1x16x128xf32>
    tpu.vector_store %arg9[%c0_37, %c0_38, %c0_39], %42 {strides = array<i32>} : memref<1x16x128xf32, #tpu.memory_space<vmem>>, vector<1x16x128xf32>,
    %c0_40 = arith.constant 0 : index
    %c12 = arith.constant 12 : index
    %c0_41 = arith.constant 0 : index
    %43 = vector.load %arg2[%c0_40, %c12, %c0_41] : memref<1x16x128xbf16, #tpu.memory_space<vmem>>, vector<1x4x128xbf16>
    %44 = vector.shape_cast %43 : vector<1x4x128xbf16> to vector<4x128xbf16>
    %c0_42 = arith.constant 0 : index
    %c0_43 = arith.constant 0 : index
    %45 = vector.load %arg10[%c0_42, %c0_43] : memref<20x128xbf16, #tpu.memory_space<vmem>>, vector<4x128xbf16>
    tpu.vector_store %arg10[%c0_42, %c0_43], %44 {strides = array<i32>} : memref<20x128xbf16, #tpu.memory_space<vmem>>, vector<4x128xbf16>,
    %46 = vector.extract_strided_slice %16 {offsets = [12, 0], sizes = [4, 128], strides = [1, 1]} : vector<16x128xf32> to vector<4x128xf32>
    %47 = arith.truncf %46 : vector<4x128xf32> to vector<4x128xbf16>
    %c0_44 = arith.constant 0 : index
    %c0_45 = arith.constant 0 : index
    %48 = vector.load %arg11[%c0_44, %c0_45] : memref<20x128xbf16, #tpu.memory_space<vmem>>, vector<4x128xbf16>
    tpu.vector_store %arg11[%c0_44, %c0_45], %47 {strides = array<i32>} : memref<20x128xbf16, #tpu.memory_space<vmem>>, vector<4x128xbf16>,
    return
  }
  func.func @transform_0(%arg0: i32, %arg1: i32) -> (i32, i32, i32) {
    %c0_i32 = arith.constant 0 : i32
    %c0_i32_0 = arith.constant 0 : i32
    return %arg0, %arg1, %c0_i32 : i32, i32, i32
  }
  func.func @transform_1(%arg0: i32, %arg1: i32) -> (i32, i32) {
    %c0_i32 = arith.constant 0 : i32
    %c0_i32_0 = arith.constant 0 : i32
    %c0_i32_1 = arith.constant 0 : i32
    return %c0_i32, %c0_i32_0 : i32, i32
  }
  func.func @transform_2(%arg0: i32, %arg1: i32) -> (i32, i32) {
    %c0_i32 = arith.constant 0 : i32
    %c0_i32_0 = arith.constant 0 : i32
    %c0_i32_1 = arith.constant 0 : i32
    return %c0_i32, %c0_i32_0 : i32, i32
  }
  func.func @transform_3(%arg0: i32, %arg1: i32) -> (i32, i32) {
    %c0_i32 = arith.constant 0 : i32
    %c0_i32_0 = arith.constant 0 : i32
    %c0_i32_1 = arith.constant 0 : i32
    return %c0_i32, %c0_i32_0 : i32, i32
  }
  func.func @transform_4(%arg0: i32, %arg1: i32) -> (i32, i32) {
    %c0_i32 = arith.constant 0 : i32
    %c0_i32_0 = arith.constant 0 : i32
    %c0_i32_1 = arith.constant 0 : i32
    return %c0_i32, %c0_i32_0 : i32, i32
  }
  func.func @transform_5(%arg0: i32, %arg1: i32) -> (i32, i32) {
    %c0_i32 = arith.constant 0 : i32
    %c0_i32_0 = arith.constant 0 : i32
    %c0_i32_1 = arith.constant 0 : i32
    return %c0_i32, %c0_i32_0 : i32, i32
  }
  func.func @transform_6(%arg0: i32, %arg1: i32) -> (i32, i32) {
    %c0_i32 = arith.constant 0 : i32
    %c0_i32_0 = arith.constant 0 : i32
    %c0_i32_1 = arith.constant 0 : i32
    return %c0_i32, %c0_i32_0 : i32, i32
  }
  func.func @transform_7(%arg0: i32, %arg1: i32) -> (i32, i32, i32) {
    %c0_i32 = arith.constant 0 : i32
    %c0_i32_0 = arith.constant 0 : i32
    return %arg0, %arg1, %c0_i32 : i32, i32, i32
  }
}

</mosaic_0001>

<bundles_post_ra>
// kernel: tpu_custom_call.1
= control target key start
LH: loop header
LB: loop body
LE: loop exit
PB: predicated region body
PF: predicated region fallthrough
CT: control target
= control target key end

     0   :  { %s2079_s0 = inlined_call_operand.hbm [shape: bf16[2,16,128], index: 0, kind: input, shape index: {}]   ;;  %s2080_s1 = inlined_call_operand.hbm [shape: bf16[384,128], index: 1, kind: input, shape index: {}]   ;;  %s2081_s2 = inlined_call_operand.vmem [shape: f32[1,128], index: 2, kind: input, shape index: {}]   ;;  %s2082_s3 = inlined_call_operand.hbm [shape: bf16[384,128], index: 3, kind: input, shape index: {}]   ;;  %s2083_s4 = inlined_call_operand.vmem [shape: f32[1,128], index: 4, kind: input, shape index: {}]   ;;  %s2084_s5 = inlined_call_operand.hbm [shape: bf16[128,128], index: 5, kind: input, shape index: {}]   ;;  %s2085_s6 = inlined_call_operand.vmem [shape: f32[1,128], index: 6, kind: input, shape index: {}]   ;;  %s2086_s7 = inlined_call_operand.hbm [shape: f32[2,16,128], index: 7, kind: output, shape index: {}]  }
   0x1   :  { %2092 = sst [smem:[#allocation19_spill]] %s2080_s1 }
   0x2   :  { %2093 = sst [smem:[#allocation20_spill]] %s2082_s3 }
   0x3   :  { %2094 = sst [smem:[#allocation21_spill]] %s2084_s5 }
   0x4   :  { %12 = vsyncpa [#allocation5], 0 }
   0x5   :  { %14 = vsyncpa [#allocation5 + $0x1], 0 }
   0x6   :  { %15 = vsyncpa [#allocation8], 0 }
   0x7   :  { %16 = vsyncpa [#allocation11], 0 }
   0x8   :  { %17 = vsyncpa [#allocation6], 0 }
   0x9   :  { %19 = vsyncpa [#allocation6 + $0x1], 0  ;;  %s1870_s24 = smov 0   ;;  %s1872_s25 = smov 0  }
   0xa   :  { %s1874_s26 = smov 0   ;;  %s1876_s27 = smov 0  }
   0xb   :  { %s1878_s28 = smov 0   ;;  %s1880_s29 = smov 0  }
   0xc LB: > { %2095 = sst [smem:[#allocation17_spill]] %s1820_s29  ;;  %s1192_s30 = sadd.s32 4294967295, %s1820_s29   ;;  %s1820_s29 = sphi %s1880_s29, %s25_s29   ;;  %s1816_s28 = sphi %s1878_s28, %s2118_s28   ;;  %s1812_s27 = sphi %s1876_s27, %s2117_s27   ;;  %s1808_s26 = sphi %s1874_s26, %s2116_s26   ;;  %s1804_s25 = sphi %s1872_s25, %s2115_s25   ;;  %s1800_s24 = sphi %s1870_s24, %s2114_s24  }
   0xd   : > { %s1193_s8 = sadd.s32 4294967294, %s1820_s29   ;;  %p59_p0 = scmp.ne.s32.totalorder %s1804_s25, %s1800_s24 }
   0xe   : > { %p1904_p1 = scmp.eq.s32.totalorder %s1192_s30, 0  ;;  %p1908_p2 = scmp.eq.s32.totalorder %s1192_s30, 1 }
   0xf   : > { %p217_p3 = scmp.eq.s32.totalorder %s1193_s8, 1  ;;  %p1194_p5 = scmp.ge.s32.totalorder %s1820_s29, 1 }
  0x10   : > { %p1914_p4 = por %p1904_p1, %p59_p0  ;;  %p224_p7 = scmp.lt.s32.totalorder %s1820_s29, 3 }
  0x11   : > { %p1919_p6 = por %p217_p3, %p59_p0  ;;  %s2100_s1 = sld [smem:[#allocation19_spill]] }
  0x12   : > { %p1927_p8 = pnand %p1194_p5, %p224_p7  ;;  %s1822_s17 = smov [#allocation7]  }
  0x13   : > { %s237_s18 = sshll.u32 %s1822_s17, 4  ;;  %p1198_p11 = scmp.ge.s32.totalorder %s1820_s29, 2  ;;  %s238_s18 = int_to_ptr.vmem [resolvable:$true] %s237_s18 }
  0x14   : > { %p1525_p9 = pneg %p1927_p8  ;;  %s2103_s3 = sld [smem:[#allocation20_spill]] }
  0x15   : > { %s2087_s23 = smov 64   ;;  %s2088_s30 = smov 4  }
  0x16   : > { %p1935_p10 = pnand %p1525_p9, %p1904_p1  ;;  %s1825_s8 = smov [#allocation9]  }
  0x17   : > { %s235_s15 = sshll.u32 %s2100_s1, 4  ;;  %s254_s13 = sshll.u32 %s1825_s8, 4  ;;  %s236_s15 = int_to_ptr.hbm [resolvable:$true] %s235_s15  ;;  %s255_s13 = int_to_ptr.vmem [resolvable:$true] %s254_s13 }
  0x18   : > { %1528 = dma.hbm_to_vmem [thread:$0]  (!%p1935_p10), %s236_s15, 3072, %s238_s18, [#allocation8], %s2087_s23, %s2087_s23, %s2088_s30  }
  0x19   : > { %s2104_s5 = sld [smem:[#allocation21_spill]]  ;;  %s1826_s21 = smov [#allocation10]  }
  0x1a   : > { %s252_s22 = sshll.u32 %s2103_s3, 4  ;;  %s271_s1 = sshll.u32 %s1826_s21, 4  ;;  %s253_s22 = int_to_ptr.hbm [resolvable:$true] %s252_s22  ;;  %s272_s1 = int_to_ptr.vmem [resolvable:$true] %s271_s1 }
  0x1b   : > { %1531 = dma.hbm_to_vmem [thread:$0]  (!%p1935_p10), %s253_s22, 3072, %s255_s13, [#allocation8], %s2087_s23, %s2087_s23, %s2088_s30  }
  0x1c   : > { %s37_s15 = sadd.s32 1, %s1816_s28  ;;  %s46_s18 = sadd.s32 1, %s1808_s26 }
  0x1d   : > { %p39_p12 = scmp.ge.s32.totalorder %s37_s15, 2  ;;  %p53_p13 = scmp.ne.s32.totalorder %s1808_s26, %s1804_s25 }
  0x1e   : > { %p54_p0 = scmp.eq.s32.totalorder %s1820_s29, 0  ;;  %p1546_p7 = scmp.lt.s32.totalorder %s1820_s29, 2 }
  0x1f   : > { %s269_s20 = sshll.u32 %s2104_s5, 4  ;;  %s2120_s15 = smov (%p39_p12, %s37_s15), 0  ;;  %s270_s20 = int_to_ptr.hbm [resolvable:$true] %s269_s20 }
  0x20   : > { %1534 = dma.hbm_to_vmem [thread:$0]  (!%p1935_p10), %s270_s20, 1024, %s272_s1, [#allocation11], %s2087_s23, %s2087_s23, %s2088_s30  }
  0x21   : > { %2105 = sst [smem:[#allocation18_spill]] %s2120_s15  ;;  %p1968_p3 = por %p54_p0, %p53_p13 }
  0x22   : > { %p1974_p5 = por %p1908_p2, %p53_p13  ;;  %s41_s8 = ssub.s32 %s1816_s28, %s2120_s15 }
  0x23   : > { %p44_p9 = scmp.eq.s32.totalorder %s41_s8, 0  ;;  %s288_s1 = sand.u32 1, %s1808_s26  }
  0x24   : > { %s1199_s13 = sshll.u32 %s288_s1, 3  ;;  %s1442_s17 = sshll.u32 %s1816_s28, 3 }
  0x25   : > { %s1983_s14 = scalar_select %p44_p9, %s1808_s26, %s46_s18  }
  0x26   : > { %s299_s23 = scalar_lea.hbm %s2079_s0, %s1442_s17  ;;  %s292_s30 = scalar_lea.vmem [#allocation4], %s1199_s13 }
  0x27   : > { %s302_s3 = sshll.u32 %s292_s30, 4  ;;  %s300_s10 = sshll.u32 %s299_s23, 4  ;;  %s303_s3 = int_to_ptr.vmem [resolvable:$true] %s302_s3  ;;  %s301_s10 = int_to_ptr.hbm [resolvable:$true] %s300_s10 }
  0x28   : > { %p1536_p2 = pnand %p1546_p7, %p1968_p3  ;;  %s289_s5 = scalar_lea.sflag [#allocation5], %s288_s1 }
  0x29   : > { %s2108_s15 = smov 4   ;;  %s2109_s29 = smov 64  }
  0x2a   : > { %1538 = dma.hbm_to_vmem [thread:$0]  (!%p1536_p2), %s301_s10, 128, %s303_s3, %s289_s5, %s2109_s29, %s2109_s29, %s2108_s15  }
  0x2b   : > { %314 = sbr.rel (%p1927_p8) target bundleno = 400 (0x190), region = 48  ;;  %s1997_s18 = sand.u32 (!%p1927_p8), 1, %s1804_s25  }
  0x2c   : > { %s1203_s30 = sshll.u32 (!%p1927_p8), %s1997_s18, 3  ;;  %s317_s23 = scalar_lea.sflag (!%p1927_p8), [#allocation5], %s1997_s18 }
  0x2d   : > { %s2001_s8 = scalar_lea.vmem (!%p1927_p8), [#allocation4], %s1203_s30 }
  0x30   : > { %1783 = dma.done.wait (%p1914_p4), %s317_s23, 128  }
  0x31   : > { %1785 = vsyncadd (%p1914_p4), %s317_s23, 4294967168 }
  0x32   : > { %1787 = dma.done.wait (%p1904_p1), [#allocation8], 6144  }
  0x33   : > { %1789 = vsyncadd (%p1904_p1), [#allocation8], 4294961152 }
  0x34   : > { %1791 = dma.done.wait (%p1904_p1), [#allocation11], 1024  }
  0x35   : > { %1793 = vsyncadd (%p1904_p1), [#allocation11], 4294966272  ;;  %v1827_v0 = vmov 0   ;;  %v1450_v1 = vld [vmem:[#allocation7 + $0x38] sm:$0xff]  ;;  %v1449_v4 = vld [vmem:[#allocation7 + $0x30] sm:$0xff]  ;;  %vm380_vm0 = vcmask 1041408  }
  0x36   : > { %374 = vst [vmem:[#allocation2] sm:$0x3] %v1827_v0  ;;  %v1458_v2 = vld [vmem:[#allocation7 + $0x78] sm:$0xff]  ;;  %624 = vmatpush.bf16.msra.mxu0 %v1450_v1  ;;  %v1457_v5 = vld [vmem:[#allocation7 + $0x70] sm:$0xff]  ;;  %v1448_v7 = vld [vmem:[#allocation7 + $0x28] sm:$0xff]  ;;  %vm381_vm1 = vcmask 1045508  }
  0x37   : > { %375 = vst [vmem:[#allocation3] sm:$0x3] %v1827_v0  ;;  %v1466_v3 = vld [vmem:[#allocation7 + $0xb8] sm:$0xff]  ;;  %638 = vmatpush.bf16.msra.mxu1 %v1458_v2  ;;  %v1465_v6 = vld [vmem:[#allocation7 + $0xb0] sm:$0xff]  ;;  %v1456_v8 = vld [vmem:[#allocation7 + $0x68] sm:$0xff]  ;;  %vm412_vm3 = vcmask 1046528  }
  0x38   : > { %652 = vmatpush.bf16.msra.mxu2 %v1466_v3  ;;  %v1464_v9 = vld [vmem:[#allocation7 + $0xa8] sm:$0xff]  ;;  %v376_v10 = vld [vmem:[%s2001_s8] sm:$0xf]  ;;  %v377_v11 = vld [vmem:[%s2001_s8 + $0x4] sm:$0xf]  ;;  %vm423_vm4 = vcmask 1045504  }
  0x39   : > { %v1447_v12 = vld [vmem:[#allocation7 + $0x20] sm:$0xff]  ;;  %vm2017_vm2 = vmor %vm380_vm0, %vm381_vm1  ;;  %v383_v14 = vrot.slane %v376_v10, 6  ;;  %v385_v15 = vrot.slane %v377_v11, 6  ;;  %v1446_v21 = vld [vmem:[#allocation7 + $0x18] sm:$0xff]  ;;  %s1207_s15 = sshll.u32 %s1997_s18, 4  ;;  %s1500_s22 = sshll.u32 %s1812_s27, 4 }
  0x3a   : > { %625 = vmatpush.bf16.msra.mxu0 %v1449_v4  ;;  %v1455_v16 = vld [vmem:[#allocation7 + $0x60] sm:$0xff]  ;;  %v1454_v22 = vld [vmem:[#allocation7 + $0x58] sm:$0xff]  ;;  %v1445_v25 = vld [vmem:[#allocation7 + $0x10] sm:$0xff]  ;;  %s1072_s17 = scalar_lea.hbm %s2086_s7, %s1500_s22  ;;  %s366_s20 = scalar_lea.vmem [#allocation12], %s1207_s15 }
  0x3b   : > { %639 = vmatpush.bf16.msra.mxu1 %v1457_v5  ;;  %v1463_v17 = vld [vmem:[#allocation7 + $0xa0] sm:$0xff]  ;;  %v384_v18 = vrot.slane %v383_v14, 4  ;;  %391 = vst [vmem:[#allocation2] sm:$0xc] %v383_v14  ;;  %v387_v19 = vrot.slane %v385_v15, 4  ;;  %v1462_v23 = vld [vmem:[#allocation7 + $0x98] sm:$0xff] }
  0x3c   : > { %653 = vmatpush.bf16.msra.mxu2 %v1465_v6  ;;  %v1051_v24 = vld [vmem:[%s2001_s8 + $0x4] sm:$0xc]  ;;  %v1444_v38 = vld [vmem:[#allocation7 + $0x8] sm:$0xff]  ;;  %v1443_v46 = vld [vmem:[#allocation7] sm:$0xff]  ;;  %s1073_s21 = sshll.u32 %s366_s20, 4  ;;  %s1075_s10 = sshll.u32 %s1072_s17, 4  ;;  %s1074_s21 = int_to_ptr.vmem [resolvable:$true] %s1073_s21  ;;  %s1076_s10 = int_to_ptr.hbm [resolvable:$true] %s1075_s10 }
  0x3d   : > { %v386_v20 = vsel %vm2017_vm2, %v384_v18, %v385_v15  ;;  %393 = vst [vmem:[#allocation2 + $0x8] sm:$0x3] %v387_v19  ;;  %v1453_v26 = vld [vmem:[#allocation7 + $0x50] sm:$0xff]  ;;  %v1436_v28 = vrot.slane %v1051_v24, 10  ;;  %v1452_v39 = vld [vmem:[#allocation7 + $0x48] sm:$0xff]  ;;  %v1451_v47 = vld [vmem:[#allocation7 + $0x40] sm:$0xff] }
  0x3e   : > { %626 = vmatpush.bf16.msra.mxu0 %v1448_v7  ;;  %392 = vst [vmem:[#allocation2 + $0x4] sm:$0xf] %v386_v20  ;;  %v1461_v30 = vld [vmem:[#allocation7 + $0x90] sm:$0xff]  ;;  %v1460_v41 = vld [vmem:[#allocation7 + $0x88] sm:$0xff]  ;;  %v1459_v50 = vld [vmem:[#allocation7 + $0x80] sm:$0xff]  ;;  %s1059_s27 = scalar_lea.sflag [#allocation6], %s1997_s18 }
  0x3f   : > { %640 = vmatpush.bf16.msra.mxu1 %v1456_v8  ;;  %v1499_v53 = vld [vmem:[#allocation10 + $0x38] sm:$0xff]  ;;  %v1498_v57 = vld [vmem:[#allocation10 + $0x30] sm:$0xff]  ;;  %v1497_v59 = vld [vmem:[#allocation10 + $0x28] sm:$0xff]  ;;  %s1744_s30 = sshra.s32 %s1076_s10, 4  ;;  %s1750_s5 = scalar_lea.hbm %s2086_s7, 32  ;;  %s1745_s30 = int_to_ptr.hbm [resolvable:$true] %s1744_s30 }
  0x40   : > { %654 = vmatpush.bf16.msra.mxu2 %v1464_v9  ;;  %v1474_v56 = vld [vmem:[#allocation9 + $0x38] sm:$0xff]  ;;  %v1473_v58 = vld [vmem:[#allocation9 + $0x30] sm:$0xff]  ;;  %v1472_v60 = vld [vmem:[#allocation9 + $0x28] sm:$0xff]  ;;  %s1746_s23 = scalar_lea.hbm %s1745_s30, 16  ;;  %p1751_p10 = scmp.lt.s32.totalorder %s1745_s30, %s2086_s7 }
  0x41   : > { %911 = vmatpush.bf16.msra.mxu3 %v1474_v56  ;;  %v1482_v61 = vld [vmem:[#allocation9 + $0x78] sm:$0xff]  ;;  %v1496_v63 = vld [vmem:[#allocation10 + $0x20] sm:$0xff]  ;;  %v1481_v1 = vld [vmem:[#allocation9 + $0x70] sm:$0xff]  ;;  %p1747_p1 = scmp.ne.s32.totalorder %s1745_s30, %s1746_s23  ;;  %p1752_p12 = scmp.lt.s32.totalorder %s1750_s5, %s1746_s23 }
  0x42   : > { %627 = vmatpush.bf16.msra.mxu0 %v1447_v12  ;;  %v396_v27 = vld [vmem:[#allocation2] sm:$0xe]  ;;  %v1471_v0 = vld [vmem:[#allocation9 + $0x20] sm:$0xff]  ;;  %v1489_v2 = vld [vmem:[#allocation9 + $0xb0] sm:$0xff] }
  0x43   : > { %641 = vmatpush.bf16.msra.mxu1 %v1455_v16  ;;  %v398_v29 = vld [vmem:[#allocation2] sm:$0xc]  ;;  %v408_v32 = vunpack.c.l.b16 %v396_v27  ;;  %v1480_v5 = vld [vmem:[#allocation9 + $0x68] sm:$0xff]  ;;  %v1494_v7 = vld [vmem:[#allocation10 + $0x10] sm:$0xff]  ;;  %p1748_p4 = pnand %p1747_p1, %p1974_p5  ;;  %p1753_p13 = por %p1752_p12, %p1751_p10 }
  0x44   : > { %655 = vmatpush.bf16.msra.mxu2 %v1463_v17  ;;  %v397_v31 = vld [vmem:[#allocation2 + $0x8] sm:$0x1]  ;;  %v419_v34 = vunpack.c.l.b16 %v398_v29  ;;  %v1490_v62 = vld [vmem:[#allocation9 + $0xb8] sm:$0xff]  ;;  %v1488_v6 = vld [vmem:[#allocation9 + $0xa8] sm:$0xff] }
  0x45   : > { %v399_v33 = vld [vmem:[#allocation2 + $0x8] sm:$0x3]  ;;  %v1502_v35 = vld [vmem:[#allocation2] sm:$0xff]   ;;  %v409_v36 = vunpack.c.l.b16 %v397_v31  ;;  %912 = vmatpush.bf16.msra.mxu3 %v1473_v58  ;;  %v1469_v8 = vld [vmem:[#allocation9 + $0x10] sm:$0xff]  ;;  %p1749_p8 = pneg %p1748_p4 }
  0x46   : > { %628 = vmatpush.bf16.msra.mxu0 %v1446_v21  ;;  %v420_v37 = vunpack.c.l.b16 %v399_v33  ;;  %v1504_v40 = vunpack.c.h.b16 %v1502_v35  ;;  %1056 = vst [vmem:[#allocation2] sm:$0x3] %v1436_v28  ;;  %v1495_v3 = vld [vmem:[#allocation10 + $0x18] sm:$0xff]  ;;  %v1479_v9 = vld [vmem:[#allocation9 + $0x60] sm:$0xff]  ;;  %v1493_v11 = vld [vmem:[#allocation10 + $0x8] sm:$0xff] }
  0x47   : > { %642 = vmatpush.bf16.msra.mxu1 %v1454_v22  ;;  %v411_v42 = vpack.c.b16 %v409_v36, %v409_v36  ;;  %v1470_v4 = vld [vmem:[#allocation9 + $0x18] sm:$0xff]  ;;  %v1487_v10 = vld [vmem:[#allocation9 + $0xa0] sm:$0xff]  ;;  %v1468_v12 = vld [vmem:[#allocation9 + $0x8] sm:$0xff]  ;;  %p1754_p0 = pnand %p1753_p13, %p1749_p8 }
  0x48   : > { %656 = vmatpush.bf16.msra.mxu2 %v1462_v23  ;;  %v422_v43 = vpack.c.b16 %v420_v37, %v420_v37  ;;  %v410_v44 = vpack.c.b16 %v1504_v40, %v408_v32  ;;  %v421_v45 = vpack.c.b16 %v1504_v40, %v419_v34  ;;  %v1478_v14 = vld [vmem:[#allocation9 + $0x58] sm:$0xff]  ;;  %v1492_v16 = vld [vmem:[#allocation10] sm:$0xff]  ;;  %v1477_v18 = vld [vmem:[#allocation9 + $0x50] sm:$0xff] }
  0x49   : > { %v414_v49 = vrot.slane %v411_v42, 1  ;;  %913 = vmatpush.bf16.msra.mxu3 %v1472_v60  ;;  %v1486_v15 = vld [vmem:[#allocation9 + $0x98] sm:$0xff]  ;;  %v1467_v17 = vld [vmem:[#allocation9] sm:$0xff]  ;;  %v1485_v19 = vld [vmem:[#allocation9 + $0x90] sm:$0xff] }
  0x4a   : > { %629 = vmatpush.bf16.msra.mxu0 %v1445_v25  ;;  %v413_v48 = vrot.slane %v410_v44, 1  ;;  %v424_v51 = vrot.slane %v421_v45, 2  ;;  %v425_v52 = vrot.slane %v422_v43, 2  ;;  %v1491_v20 = vld [vmem:[%s2001_s8] sm:$0xff]  ;;  %v1476_v23 = vld [vmem:[#allocation9 + $0x48] sm:$0xff]  ;;  %v1475_v27 = vld [vmem:[#allocation9 + $0x40] sm:$0xff] }
  0x4b   : > { %643 = vmatpush.bf16.msra.mxu1 %v1453_v26  ;;  %v1607_v21 = vld [vmem:[%s2081_s2] ss:$0 sm:$0xff]  ;;  %v1484_v24 = vld [vmem:[#allocation9 + $0x88] sm:$0xff]  ;;  %v1483_v28 = vld [vmem:[#allocation9 + $0x80] sm:$0xff] }
  0x4c   : > { %657 = vmatpush.bf16.msra.mxu2 %v1461_v30  ;;  %v415_v54 = vsel %vm412_vm3, %v413_v48, %v414_v49  ;;  %v426_v55 = vsel %vm423_vm4, %v424_v51, %v425_v52 }
  0x4d   : > { %914 = vmatpush.bf16.msra.mxu3 %v1471_v0 }
  0x4e   : > { %630 = vmatpush.bf16.msra.mxu0 %v1444_v38 }
  0x4f   : > { %644 = vmatpush.bf16.msra.mxu1 %v1452_v39 }
  0x50   : > { %658 = vmatpush.bf16.msra.mxu2 %v1460_v41 }
  0x51   : > { %915 = vmatpush.bf16.msra.mxu3 %v1470_v4  ;;  %v1608_v4 = vld [vmem:[%s2085_s6] ss:$0 sm:$0xff] }
  0x52   : > { %631 = vmatpush.bf16.msra.mxu0 %v1443_v46 }
  0x53   : > { %645 = vmatpush.bf16.msra.mxu1 %v1451_v47 }
  0x54   : > { %659 = vmatpush.bf16.msra.mxu2 %v1459_v50 }
  0x55   : > { %632 = vmatmul.bf16.vlgmr.msra.gmra.mxu0 %v1502_v35  ;;  %916 = vmatpush.bf16.msra.mxu3 %v1469_v8 }
  0x56   : > { %646 = vmatmul.bf16.vlgmr.msra.gmra.mxu1 %v415_v54  ;;  %925 = vmatpush.bf16.msrb.mxu0 %v1482_v61 }
  0x57   : > { %660 = vmatmul.bf16.vlgmr.msra.gmra.mxu2 %v426_v55  ;;  %939 = vmatpush.bf16.msrb.mxu1 %v1490_v62 }
  0x58   : > { %1031 = vmatpush.bf16.msrb.mxu2 %v1499_v53 }
  0x59   : > { %917 = vmatpush.bf16.msra.mxu3 %v1468_v12 }
  0x5a   : > { %926 = vmatpush.bf16.msrb.mxu0 %v1481_v1 }
  0x5b   : > { %940 = vmatpush.bf16.msrb.mxu1 %v1489_v2  ;;  %v1609_v2 = vld [vmem:[%s2083_s4] ss:$0 sm:$0xff] }
  0x5c   : > { %1032 = vmatpush.bf16.msrb.mxu2 %v1498_v57 }
  0x5d   : > { %918 = vmatpush.bf16.msra.mxu3 %v1467_v17 }
  0x5e   : > { %927 = vmatpush.bf16.msrb.mxu0 %v1480_v5 }
  0x5f   : > { %941 = vmatpush.bf16.msrb.mxu1 %v1488_v6 }
  0x60   : > { %1033 = vmatpush.bf16.msrb.mxu2 %v1497_v59 }
  0x62   : > { %928 = vmatpush.bf16.msrb.mxu0 %v1479_v9 }
  0x63   : > { %942 = vmatpush.bf16.msrb.mxu1 %v1487_v10 }
  0x64   : > { %1034 = vmatpush.bf16.msrb.mxu2 %v1496_v63 }
  0x66   : > { %929 = vmatpush.bf16.msrb.mxu0 %v1478_v14 }
  0x67   : > { %943 = vmatpush.bf16.msrb.mxu1 %v1486_v15 }
  0x68   : > { %1035 = vmatpush.bf16.msrb.mxu2 %v1495_v3 }
  0x6a   : > { %930 = vmatpush.bf16.msrb.mxu0 %v1477_v18 }
  0x6b   : > { %944 = vmatpush.bf16.msrb.mxu1 %v1485_v19 }
  0x6c   : > { %1036 = vmatpush.bf16.msrb.mxu2 %v1494_v7 }
  0x6e   : > { %931 = vmatpush.bf16.msrb.mxu0 %v1476_v23 }
  0x6f   : > { %945 = vmatpush.bf16.msrb.mxu1 %v1484_v24 }
  0x70   : > { %1037 = vmatpush.bf16.msrb.mxu2 %v1493_v11 }
  0x72   : > { %932 = vmatpush.bf16.msrb.mxu0 %v1475_v27 }
  0x73   : > { %946 = vmatpush.bf16.msrb.mxu1 %v1483_v28 }
  0x74   : > { %1038 = vmatpush.bf16.msrb.mxu2 %v1492_v16 }
  0x77   : > { %1039 = vmatmul.bf16.vlgmr.msrb.gmra.mxu2 %v1491_v20 }
  0xd2   : > { %v633_v22 = vpop.f32.mrf.mxu0 }
  0xd3   : > { %v634_v25 = vadd.f32 %v1607_v21, %v633_v22  ;;  %v647_v26 = vpop.f32.mrf.mxu1 }
  0xd5   : > { %v648_v29 = vadd.f32 %v647_v26, %v634_v25 }
  0xda   : > { %v661_v30 = vpop.f32.mrf.mxu2  ;;  %v635_v32 = vpop.f32.mrf.mxu0 }
  0xdb   : > { %v662_v31 = vadd.f32 %v661_v30, %v648_v29  ;;  %v636_v34 = vadd.f32 %v1607_v21, %v635_v32  ;;  %v649_v36 = vpop.f32.mrf.mxu1 }
  0xdd   : > { %v666_v33 = vmax.f32 %v662_v31, 0.0  ;;  %v650_v38 = vadd.f32 %v649_v36, %v636_v34 }
  0xdf   : > { %v668_v35 = vpack.c.bf16 %v666_v33, %v666_v33 }
  0xe1   : > { %v672_v37 = vrot.slane %v668_v35, 6 }
  0xe2   : > { %v663_v39 = vpop.f32.mrf.mxu2 }
  0xe3   : > { %680 = vst [vmem:[#allocation3] sm:$0xc] %v672_v37  ;;  %v664_v40 = vadd.f32 %v663_v39, %v650_v38  ;;  %v673_v43 = vrot.slane %v672_v37, 4 }
  0xe5   : > { %v667_v41 = vmax.f32 %v664_v40, 0.0 }
  0xe7   : > { %v669_v42 = vpack.c.bf16 %v667_v41, %v667_v41 }
  0xe9   : > { %v674_v44 = vrot.slane %v669_v42, 6 }
  0xea   : > { %v685_v47 = vld [vmem:[#allocation3] sm:$0xe] }
  0xeb   : > { %v675_v45 = vsel %vm2017_vm2, %v673_v43, %v674_v44  ;;  %v676_v46 = vrot.slane %v674_v44, 4  ;;  %v687_v48 = vld [vmem:[#allocation3] sm:$0xc]  ;;  %v697_v51 = vunpack.c.l.b16 %v685_v47 }
  0xec   : > { %681 = vst [vmem:[#allocation3 + $0x4] sm:$0xf] %v675_v45  ;;  %v707_v52 = vunpack.c.l.b16 %v687_v48 }
  0xed   : > { %682 = vst [vmem:[#allocation3 + $0x8] sm:$0x3] %v676_v46 }
  0xf3   : > { %v1506_v49 = vld [vmem:[#allocation3] sm:$0xff]  }
  0xf4   : > { %v1508_v50 = vunpack.c.h.b16 %v1506_v49  ;;  %919 = vmatmul.bf16.vlgmr.msra.gmra.mxu3 %v1506_v49  ;;  %1057 = vst [vmem:[#allocation3] sm:$0x3] %v676_v46  ;;  %v686_v53 = vld [vmem:[#allocation3 + $0x8] sm:$0x1] }
  0xf5   : > { %v688_v54 = vld [vmem:[#allocation3 + $0x8] sm:$0x3]  ;;  %v698_v55 = vunpack.c.l.b16 %v686_v53 }
  0xf6   : > { %v708_v56 = vunpack.c.l.b16 %v688_v54  ;;  %v699_v57 = vpack.c.b16 %v1508_v50, %v697_v51  ;;  %v709_v58 = vpack.c.b16 %v1508_v50, %v707_v52 }
  0xf7   : > { %v700_v59 = vpack.c.b16 %v698_v55, %v698_v55 }
  0xf8   : > { %v710_v13 = vpack.c.b16 %v708_v56, %v708_v56  ;;  %v701_v60 = vrot.slane %v699_v57, 1  ;;  %v711_v61 = vrot.slane %v709_v58, 2 }
  0xf9   : > { %v702_v62 = vrot.slane %v700_v59, 1 }
  0xfa   : > { %v712_v63 = vrot.slane %v710_v13, 2  ;;  %v1040_v5 = vpop.f32.mrf.mxu2 }
  0xfb   : > { %v703_v0 = vsel %vm412_vm3, %v701_v60, %v702_v62  ;;  %v1041_v10 = vadd.f32 %v1608_v4, %v1040_v5 }
  0xfc   : > { %v713_v1 = vsel %vm423_vm4, %v711_v61, %v712_v63  ;;  %933 = vmatmul.bf16.vlgmr.msrb.gmra.mxu0 %v703_v0 }
  0xfd   : > { %947 = vmatmul.bf16.vlgmr.msrb.gmra.mxu1 %v713_v1 }
 0x102   : > { %v1042_v20 = vpop.f32.mrf.mxu2 }
 0x103   : > { %v1043_v23 = vadd.f32 %v1608_v4, %v1042_v20 }
 0x177   : > { %v920_v3 = vpop.f32.mrf.mxu3 }
 0x178   : > { %v921_v6 = vadd.f32 %v1609_v2, %v920_v3 }
 0x179   : > { %v934_v7 = vpop.f32.mrf.mxu0 }
 0x17a   : > { %v948_v8 = vpop.f32.mrf.mxu1  ;;  %v935_v9 = vadd.f32 %v934_v7, %v921_v6 }
 0x17c   : > { %v949_v11 = vadd.f32 %v948_v8, %v935_v9 }
 0x17e   : > { %v953_v12 = vmax.f32 %v949_v11, 0.0 }
 0x17f   : > { %v922_v14 = vpop.f32.mrf.mxu3 }
 0x180   : > { %v1045_v15 = vadd.f32 %v1041_v10, %v953_v12  ;;  %v923_v16 = vadd.f32 %v1609_v2, %v922_v14 }
 0x181   : > { %v936_v17 = vpop.f32.mrf.mxu0 }
 0x182   : > { %v1047_v18 = vmax.f32 %v1045_v15, 0.0  ;;  %v937_v19 = vadd.f32 %v936_v17, %v923_v16  ;;  %v950_v21 = vpop.f32.mrf.mxu1 }
 0x184   : > { %1049 = vst [vmem:[%s366_s20] sm:$0xff] %v1047_v18  ;;  %v951_v22 = vadd.f32 %v950_v21, %v937_v19 }
 0x186   : > { %v954_v24 = vmax.f32 %v951_v22, 0.0 }
 0x188   : > { %v1046_v25 = vadd.f32 %v1043_v23, %v954_v24 }
 0x18a   : > { %v1048_v26 = vmax.f32 %v1046_v25, 0.0 }
 0x18c   : > { %1050 = vst [vmem:[%s366_s20 + $0x8] sm:$0xff] %v1048_v26 }
 0x18d   : > { %1757 = shalt.err (!%p1754_p0)
}
 0x18e   : > { %s1828_s18 = smov 128   ;;  %s1829_s11 = smov 8  }
 0x18f   : > { %1523 = dma.vmem_to_hbm [thread:$0]  (%p1974_p5), %s1074_s21, 256, %s1076_s10, %s1059_s27, %s1828_s18, %s1828_s18, %s1829_s11  }
 0x190 PF: > { %s2112_s16 = sld [smem:[#allocation17_spill]]  ;;  %s1090_s15 = sand.u32 1, %s1800_s24  }
 0x191   : > { %p1540_p3 = pnand %p1198_p11, %p1919_p6  ;;  %s1091_s22 = scalar_lea.sflag [#allocation6], %s1090_s15 }
 0x193   : > { %p1541_p7 = pneg %p1540_p3 }
 0x195   : > { %1795 = dma.done.wait (%p1541_p7), %s1091_s22, 256  }
 0x196   : > { %1797 = vsyncadd (%p1541_p7), %s1091_s22, 4294967040  ;;  %s25_s29 = sadd.s32 1, %s2112_s16   ;;  %s2113_s19 = sld [smem:[#allocation18_spill]] }
 0x197   : > { %p22_p9 = scmp.ge.s32.totalorder %s25_s29, 4   ;;  %s2114_s24 = smov %s1804_s25 }
 0x198   : > { %s2115_s25 = smov %s1808_s26  ;;  %s2116_s26 = smov %s1983_s14 }
 0x199   : > { %s2117_s27 = smov %s1816_s28  ;;  %24 = sbr.rel (!%p22_p9) target bundleno = 12 (0xc), region = 109 }
 0x19c   : > { %s2118_s28 = smov %s2113_s19 }
 0x19e   :  { %1097 = vsyncpa [#allocation5], 1 }
 0x19f   :  { %1099 = vsyncpa [#allocation5 + $0x1], 1 }
 0x1a0   :  { %1100 = vsyncpa [#allocation8], 1 }
 0x1a1   :  { %1101 = vsyncpa [#allocation11], 1 }
 0x1a2   :  { %1102 = vsyncpa [#allocation6], 1 }
 0x1a3   :  { %1104 = vsyncpa [#allocation6 + $0x1], 1 }

</bundles_post_ra>
